<compile_context>
chip_gen: v7x
topology: tpu7x:2x2x1
jax: 0.10.0
libtpu: 0.0.40
codegen_flags: <defaults>
</compile_context>

<pallas_src>
import functools

import jax
import jax.numpy as jnp
import numpy as np
from jax.experimental import pallas as pl
from jax.experimental.pallas import tpu as pltpu

_MASK = -1e30        # additive mask for non-edges (finite -> no inf/nan paths)
_M_INIT = -1e30      # online-softmax running-max init
_M_FLOOR = -1e20     # floor for the softmax shift (guards row tiles with no edges yet)
_VMEM_LIMIT = 32 * 1024 * 1024


def _round_up(a, b):
    return ((a + b - 1) // b) * b


def _choose_tiles(n):
    """Return (padded N, destination-row tile TM, source-column tile TK)."""
    if n <= 1024:
        npad = _round_up(n, 128)
        return npad, npad, npad
    return _round_up(n, 512), 256, 512


# ----------------------------------------------------------------------------
# Kernel 1a: projection prologue. xw = x @ W once per layer (not once per attention
#            tile), and src/dst attention logits from a single combined matmul.
# ----------------------------------------------------------------------------
def gat_proj_kernel(x_ref, w_ref, att_ref, xw_ref, a_ref):
    # x_ref [TM, F_in] bf16, w_ref [F_in, H*F] bf16, att_ref [H*F, 2H] f32
    xw = jnp.dot(x_ref[...], w_ref[...], preferred_element_type=jnp.float32)
    a_ref[...] = jnp.dot(xw, att_ref[...], preferred_element_type=jnp.float32)  # [TM, 2H]
    xw_ref[...] = xw.astype(jnp.bfloat16)                                        # [TM, H*F]


# ----------------------------------------------------------------------------
# Kernel 1b: tiled masked attention + aggregation with online softmax.
#            grid = (dst row tiles [parallel], src column tiles [arbitrary]).
# ----------------------------------------------------------------------------
def gat_attn_kernel(a_dst_ref, a_srcT_ref, adj_ref, xw_ref, bias_ref, out_ref,
                    m_scr, l_scr, acc_scr, *, heads, fout, concat):
    k = pl.program_id(1)

    @pl.when(k == 0)
    def _():
        m_scr[...] = jnp.full_like(m_scr, _M_INIT)
        l_scr[...] = jnp.zeros_like(l_scr)
        acc_scr[...] = jnp.zeros_like(acc_scr)

    adj = adj_ref[...]                                                   # [TM, TK] bf16
    mask_bias = jnp.where(adj > 0, 0.0, _MASK).astype(jnp.float32)       # hoisted: once/tile
    a_dst = a_dst_ref[...]                                               # [TM, H]  f32
    a_srcT = a_srcT_ref[...]                                             # [H, TK]  f32
    xw = xw_ref[...]                                                     # [TK, H*F] bf16

    for h in range(heads):                                               # static, H is small
        sl = slice(h * fout, (h + 1) * fout)
        # e[i, j] = leaky_relu(a_dst[i, h] + a_src[j, h], 0.2), masked to edges j -> i
        e = a_dst[:, h:h + 1] + a_srcT[h:h + 1, :]                       # [TM, TK]
        e = jnp.where(e > 0, e, 0.2 * e)
        e = e + mask_bias
        m_prev = m_scr[:, h:h + 1]
        m_new = jnp.maximum(m_prev, jnp.max(e, axis=-1, keepdims=True))
        m_shift = jnp.maximum(m_new, _M_FLOOR)                           # safe for empty rows
        corr = jnp.exp(m_prev - m_shift)
        p = jnp.exp(e - m_shift)                                         # masked entries -> 0
        l_scr[:, h:h + 1] = corr * l_scr[:, h:h + 1] + jnp.sum(p, axis=-1, keepdims=True)
        acc_scr[:, sl] = corr * acc_scr[:, sl] + jnp.dot(
            p.astype(jnp.bfloat16), xw[:, sl], preferred_element_type=jnp.float32)
        m_scr[:, h:h + 1] = m_new

    @pl.when(k == pl.num_programs(1) - 1)
    def _():
        # Deferred softmax normalization on [TM, H*F] (not on [TM, TK]); EUP reciprocal.
        inv_l = pl.reciprocal(l_scr[...], approx=True)                   # [TM, H]
        for h in range(heads):
            sl = slice(h * fout, (h + 1) * fout)
            acc_scr[:, sl] = acc_scr[:, sl] * inv_l[:, h:h + 1]
        if concat:
            res = acc_scr[...]
        else:
            res = acc_scr[:, 0:fout]
            for h in range(1, heads):
                res = res + acc_scr[:, h * fout:(h + 1) * fout]
            res = res * (1.0 / heads)
        out_ref[...] = jnp.maximum(res + bias_ref[...], 0.0)             # bias + fused ReLU


def gat_conv_pallas(x, adj_bf16, W, att_src, att_dst, bias, *,
                    heads, fout, concat, tm, tk):
    npad = adj_bf16.shape[0]
    hf = heads * fout
    out_dim = hf if concat else fout
    fin = x.shape[1]
    n_row = npad // tm
    n_col = npad // tk

    # Block-diagonal per-head attention projections, fused into ONE [H*F, 2H] matrix so src
    # and dst logits come from a single matmul in the prologue.
    eye_h = jnp.eye(heads, dtype=jnp.float32)
    asrc_mat = jnp.einsum('hf,hg->hfg', att_src.astype(jnp.float32), eye_h).reshape(hf, heads)
    adst_mat = jnp.einsum('hf,hg->hfg', att_dst.astype(jnp.float32), eye_h).reshape(hf, heads)
    att_cat = jnp.concatenate([asrc_mat, adst_mat], axis=1)              # [H*F, 2H]

    xw_bf16, a_all = pl.pallas_call(
        gat_proj_kernel,
        out_shape=(jax.ShapeDtypeStruct((npad, hf), jnp.bfloat16),
                   jax.ShapeDtypeStruct((npad, 2 * heads), jnp.float32)),
        grid=(n_row,),
        in_specs=[
            pl.BlockSpec((tm, fin), lambda i: (i, 0)),
            pl.BlockSpec((fin, hf), lambda i: (0, 0)),
            pl.BlockSpec((hf, 2 * heads), lambda i: (0, 0)),
        ],
        out_specs=(pl.BlockSpec((tm, hf), lambda i: (i, 0)),
                   pl.BlockSpec((tm, 2 * heads), lambda i: (i, 0))),
        compiler_params=pltpu.CompilerParams(
            dimension_semantics=("parallel",),
            vmem_limit_bytes=_VMEM_LIMIT),
    )(x.astype(jnp.bfloat16), W.astype(jnp.bfloat16), att_cat)

    a_srcT = a_all[:, :heads].T                      # [H, npad] transpose hoisted to wrapper
    a_dst = a_all[:, heads:]                         # [npad, H]
    bias_2d = bias.reshape(1, out_dim).astype(jnp.float32)

    kernel = functools.partial(gat_attn_kernel, heads=heads, fout=fout, concat=concat)
    return pl.pallas_call(
        kernel,
        out_shape=jax.ShapeDtypeStruct((npad, out_dim), jnp.float32),
        grid=(n_row, n_col),
        in_specs=[
            pl.BlockSpec((tm, heads), lambda i, k: (i, 0)),      # destination logits
            pl.BlockSpec((heads, tk), lambda i, k: (0, k)),      # source logits (transposed)
            pl.BlockSpec((tm, tk), lambda i, k: (i, k)),         # adjacency tile (bf16 mask)
            pl.BlockSpec((tk, hf), lambda i, k: (k, 0)),         # projected source features
            pl.BlockSpec((1, out_dim), lambda i, k: (0, 0)),     # bias
        ],
        out_specs=pl.BlockSpec((tm, out_dim), lambda i, k: (i, 0)),
        scratch_shapes=[
            pltpu.VMEM((tm, heads), jnp.float32),                # running max  m
            pltpu.VMEM((tm, heads), jnp.float32),                # running sum  l
            pltpu.VMEM((tm, hf), jnp.float32),                   # un-normalized accumulator
        ],
        compiler_params=pltpu.CompilerParams(
            dimension_semantics=("parallel", "arbitrary"),
            vmem_limit_bytes=_VMEM_LIMIT),
    )(a_dst, a_srcT, adj_bf16, xw_bf16, bias_2d)


# ----------------------------------------------------------------------------
# Kernel 2: global_mean_pool (dense averaging matmul) fused with the final Linear.
# ----------------------------------------------------------------------------
def pool_fc_kernel(pool_ref, h_ref, wfc_ref, bfc_ref, out_ref):
    pooled = jnp.dot(pool_ref[...], h_ref[...], preferred_element_type=jnp.float32)   # [B, 16]
    out_ref[...] = jnp.dot(pooled, wfc_ref[...],
                           preferred_element_type=jnp.float32) + bfc_ref[...]          # [B, C]


def pool_fc_pallas(pool_mat, h, Wfc, bfc):
    B = pool_mat.shape[0]
    C = Wfc.shape[1]
    bfc_2d = bfc.reshape(1, C)

    def full_spec(shape):
        return pl.BlockSpec(shape, lambda i: (0,) * len(shape))

    return pl.pallas_call(
        pool_fc_kernel,
        out_shape=jax.ShapeDtypeStruct((B, C), jnp.float32),
        grid=(1,),
        in_specs=[full_spec(pool_mat.shape), full_spec(h.shape),
                  full_spec(Wfc.shape), full_spec(bfc_2d.shape)],
        out_specs=full_spec((B, C)),
        compiler_params=pltpu.CompilerParams(
            dimension_semantics=("arbitrary",),
            vmem_limit_bytes=_VMEM_LIMIT),
    )(pool_mat, h, Wfc, bfc_2d)


# ----------------------------------------------------------------------------
# Full GAT forward (eval mode)
# ----------------------------------------------------------------------------
def gat_forward(x, edge_index, edge_attr, node_ids, params, *, heads, hidden, num_graphs):
    del edge_attr  # GATConv ignores edge_attr when edge_dim is None (matches reference)
    N = x.shape[0]
    npad, tm, tk = _choose_tiles(N)

    # Dense edge mask with self-loops for every node (including padded ones, which keeps
    # every softmax row non-empty and the whole pipeline NaN/Inf free); bf16 halves HBM
    # traffic of the dominant array (adj is streamed once per GAT layer).
    # TODO(synk): for large graphs drop the dense O(N^2) mask and stream CSR neighbor lists
    # via PrefetchScalarGridSpec scalar prefetch instead.
    src, dst = edge_index[0], edge_index[1]
    adj = jnp.zeros((npad, npad), jnp.float32).at[dst, src].set(1.0)
    adj = jnp.maximum(adj, jnp.eye(npad, dtype=jnp.float32)).astype(jnp.bfloat16)

    x_pad = jnp.zeros((npad, x.shape[1]), jnp.float32).at[:N, :].set(x)

    # conv1: in -> hidden, H heads, concat   (dropouts are identity in eval mode)
    h1 = gat_conv_pallas(x_pad, adj, params['W1'], params['asrc1'], params['adst1'],
                         params['b1'], heads=heads, fout=hidden, concat=True,
                         tm=tm, tk=tk)
    # conv2: H*hidden -> 16, 1 head, concat=False
    h2 = gat_conv_pallas(h1, adj, params['W2'], params['asrc2'], params['adst2'],
                         params['b2'], heads=1, fout=16, concat=False,
                         tm=tm, tk=tk)

    # global_mean_pool as a [B, npad] averaging matrix; padded nodes get an out-of-range
    # graph id so their one-hot row is zero (no contribution).
    ids_pad = jnp.full((npad,), num_graphs, jnp.int32).at[:N].set(node_ids)
    one_hot = jax.nn.one_hot(ids_pad, num_graphs, dtype=jnp.float32)     # [npad, B]
    counts = jnp.maximum(jnp.sum(one_hot, axis=0, keepdims=True), 1.0)   # [1, B]
    pool_mat = (one_hot / counts).T                                      # [B, npad]

    return pool_fc_pallas(pool_mat, h2, params['Wfc'], params['bfc'])


# ----------------------------------------------------------------------------
# Pure-JAX reference (same eval-mode math, f32 everywhere) for a correctness check.
# ----------------------------------------------------------------------------
def _gat_layer_ref(x, adj, W, asrc, adst, b, heads, fout, concat):
    n = x.shape[0]
    xw = (x @ W).reshape(n, heads, fout)
    a_src = jnp.einsum('nhf,hf->nh', xw, asrc)
    a_dst = jnp.einsum('nhf,hf->nh', xw, adst)
    e = a_dst[:, None, :] + a_src[None, :, :]          # [dst i, src j, head]
    e = jnp.where(e > 0, e, 0.2 * e)
    e = jnp.where((adj > 0)[:, :, None], e, _MASK)
    p = jax.nn.softmax(e, axis=1)
    out = jnp.einsum('ijh,jhf->ihf', p, xw)
    out = out.reshape(n, heads * fout) if concat else jnp.mean(out, axis=1)
    return jax.nn.relu(out + b)


def gat_forward_ref(x, edge_index, node_ids, params, *, heads, hidden, num_graphs):
    N = x.shape[0]
    src, dst = edge_index[0], edge_index[1]
    adj = jnp.zeros((N, N), jnp.float32).at[dst, src].set(1.0)
    adj = jnp.maximum(adj, jnp.eye(N, dtype=jnp.float32))
    h1 = _gat_layer_ref(x, adj, params['W1'], params['asrc1'], params['adst1'],
                        params['b1'], heads, hidden, True)
    h2 = _gat_layer_ref(h1, adj, params['W2'], params['asrc2'], params['adst2'],
                        params['b2'], 1, 16, False)
    one_hot = jax.nn.one_hot(node_ids, num_graphs, dtype=jnp.float32)    # [N, B]
    pooled = (one_hot.T @ h2) / jnp.maximum(one_hot.sum(0)[:, None], 1.0)
    return pooled @ params['Wfc'] + params['bfc']


if __name__ == "__main__":
    # Small synthetic problem: 2 graphs of 8 nodes each (bidirectional rings).
    in_channels, hidden_channels, out_channels, heads = 8, 8, 3, 4
    N, B = 16, 2

    key = jax.random.PRNGKey(0)
    keys = jax.random.split(key, 10)

    # Deterministic parameter init (synthetic; shapes follow GATConv/Linear __init__)
    params = {
        'W1':    0.2 * jax.random.normal(keys[0], (in_channels, heads * hidden_channels), jnp.float32),
        'asrc1': 0.2 * jax.random.normal(keys[1], (heads, hidden_channels), jnp.float32),
        'adst1': 0.2 * jax.random.normal(keys[2], (heads, hidden_channels), jnp.float32),
        'b1':    jnp.zeros((heads * hidden_channels,), jnp.float32),
        'W2':    0.2 * jax.random.normal(keys[3], (heads * hidden_channels, 16), jnp.float32),
        'asrc2': 0.2 * jax.random.normal(keys[4], (1, 16), jnp.float32),
        'adst2': 0.2 * jax.random.normal(keys[5], (1, 16), jnp.float32),
        'b2':    jnp.zeros((16,), jnp.float32),
        'Wfc':   0.2 * jax.random.normal(keys[6], (16, out_channels), jnp.float32),
        'bfc':   jnp.zeros((out_channels,), jnp.float32),
    }

    # Inputs
    x = jax.random.normal(keys[7], (N, in_channels), jnp.float32)
    src, dst = [], []
    for g in range(B):
        base = g * 8
        for i in range(8):
            j = (i + 1) % 8
            src += [base + i, base + j]
            dst += [base + j, base + i]
    edge_index = jnp.array([src, dst], dtype=jnp.int32)               # [2, 32]
    edge_attr = jax.random.normal(keys[8], (edge_index.shape[1], 1), jnp.float32)  # unused by GATConv
    node_ids = jnp.array([0] * 8 + [1] * 8, dtype=jnp.int32)          # graph assignment

    out = gat_forward(x, edge_index, edge_attr, node_ids, params,
                      heads=heads, hidden=hidden_channels, num_graphs=B)
    out = jax.block_until_ready(out)
    assert out.shape == (B, out_channels)
    assert bool(jnp.all(jnp.isfinite(out)))

    # Correctness check against the pure-JAX f32 reference (kernel streams bf16 tiles and
    # uses an approx reciprocal, so tolerance is loose).
    ref = jax.block_until_ready(
        gat_forward_ref(x, edge_index, node_ids, params,
                        heads=heads, hidden=hidden_channels, num_graphs=B))
    np.testing.assert_allclose(np.asarray(out), np.asarray(ref), rtol=5e-2, atol=5e-2)

    print("KERNEL_OK")
</pallas_src>

<mosaic_0001>
module attributes {stable_mosaic.version = 11 : i64} {
  func.func @gat_proj_kernel(%arg0: i32, %arg1: memref<128x8xbf16, #tpu.memory_space<vmem>>, %arg2: memref<8x32xbf16, #tpu.memory_space<vmem>>, %arg3: memref<32x8xf32, #tpu.memory_space<vmem>>, %arg4: memref<128x32xbf16, #tpu.memory_space<vmem>>, %arg5: memref<128x8xf32, #tpu.memory_space<vmem>>) attributes {dimension_semantics = [#tpu.dimension_semantics<parallel>], iteration_bounds = array<i64: 1>, scalar_prefetch = 0 : i64, scratch_operands = 0 : i64, tpu.core_type = #tpu.core_type<tc>, window_params = [{transform_indices = @transform_0, window_bounds = array<i64: 128, 8>}, {pipeline_mode = #tpu.pipeline_mode<synchronous>, transform_indices = @transform_1, window_bounds = array<i64: 8, 32>}, {pipeline_mode = #tpu.pipeline_mode<synchronous>, transform_indices = @transform_2, window_bounds = array<i64: 32, 8>}, {transform_indices = @transform_3, window_bounds = array<i64: 128, 32>}, {transform_indices = @transform_4, window_bounds = array<i64: 128, 8>}]} {
    %c0 = arith.constant 0 : index
    %c0_0 = arith.constant 0 : index
    %0 = vector.load %arg1[%c0, %c0_0] : memref<128x8xbf16, #tpu.memory_space<vmem>>, vector<128x8xbf16>
    %c0_1 = arith.constant 0 : index
    %c0_2 = arith.constant 0 : index
    %1 = vector.load %arg2[%c0_1, %c0_2] : memref<8x32xbf16, #tpu.memory_space<vmem>>, vector<8x32xbf16>
    %cst = arith.constant dense<0.000000e+00> : vector<128x32xf32>
    %2 = tpu.matmul %0, %1, %cst {dimension_numbers = #tpu.dot_dimension_numbers<[1], [0], [0], [1], [0, 0, 1, 1], [], []>} : vector<128x8xbf16>, vector<8x32xbf16>, vector<128x32xf32> -> vector<128x32xf32>
    %c0_3 = arith.constant 0 : index
    %c0_4 = arith.constant 0 : index
    %3 = vector.load %arg3[%c0_3, %c0_4] : memref<32x8xf32, #tpu.memory_space<vmem>>, vector<32x8xf32>
    %cst_5 = arith.constant dense<0.000000e+00> : vector<128x8xf32>
    %4 = tpu.matmul %2, %3, %cst_5 {dimension_numbers = #tpu.dot_dimension_numbers<[1], [0], [0], [1], [0, 0, 1, 1], [], []>} : vector<128x32xf32>, vector<32x8xf32>, vector<128x8xf32> -> vector<128x8xf32>
    %c0_6 = arith.constant 0 : index
    %c0_7 = arith.constant 0 : index
    %5 = vector.load %arg5[%c0_6, %c0_7] : memref<128x8xf32, #tpu.memory_space<vmem>>, vector<128x8xf32>
    tpu.vector_store %arg5[%c0_6, %c0_7], %4 {strides = array<i32>} : memref<128x8xf32, #tpu.memory_space<vmem>>, vector<128x8xf32>,
    %6 = arith.truncf %2 : vector<128x32xf32> to vector<128x32xbf16>
    %c0_8 = arith.constant 0 : index
    %c0_9 = arith.constant 0 : index
    %7 = vector.load %arg4[%c0_8, %c0_9] : memref<128x32xbf16, #tpu.memory_space<vmem>>, vector<128x32xbf16>
    tpu.vector_store %arg4[%c0_8, %c0_9], %6 {strides = array<i32>} : memref<128x32xbf16, #tpu.memory_space<vmem>>, vector<128x32xbf16>,
    return
  }
  func.func @transform_0(%arg0: i32) -> (i32, i32) {
    %c0_i32 = arith.constant 0 : i32
    %c0_i32_0 = arith.constant 0 : i32
    return %arg0, %c0_i32 : i32, i32
  }
  func.func @transform_1(%arg0: i32) -> (i32, i32) {
    %c0_i32 = arith.constant 0 : i32
    %c0_i32_0 = arith.constant 0 : i32
    %c0_i32_1 = arith.constant 0 : i32
    return %c0_i32, %c0_i32_0 : i32, i32
  }
  func.func @transform_2(%arg0: i32) -> (i32, i32) {
    %c0_i32 = arith.constant 0 : i32
    %c0_i32_0 = arith.constant 0 : i32
    %c0_i32_1 = arith.constant 0 : i32
    return %c0_i32, %c0_i32_0 : i32, i32
  }
  func.func @transform_3(%arg0: i32) -> (i32, i32) {
    %c0_i32 = arith.constant 0 : i32
    %c0_i32_0 = arith.constant 0 : i32
    return %arg0, %c0_i32 : i32, i32
  }
  func.func @transform_4(%arg0: i32) -> (i32, i32) {
    %c0_i32 = arith.constant 0 : i32
    %c0_i32_0 = arith.constant 0 : i32
    return %arg0, %c0_i32 : i32, i32
  }
}

</mosaic_0001>

<bundles_post_ra>
// kernel: tpu_custom_call.1
= control target key start
LH: loop header
LB: loop body
LE: loop exit
PB: predicated region body
PF: predicated region fallthrough
CT: control target
= control target key end

     0   :  { %vm99_vm0 = vcmask 1043456   ;;  %vm74_vm1 = vcmask 64512   ;;  %vm204_vm2 = vcmask 261120   ;;  %vm478_vm3 = vcmask 257024   ;;  %s879_s1 = inlined_call_operand.vmem [shape: bf16[8,32], index: 1, kind: input, shape index: {}]   ;;  %s880_s0 = inlined_call_operand.vmem [shape: bf16[128,8], index: 0, kind: input, shape index: {}]   ;;  %s881_s2 = inlined_call_operand.vmem [shape: f32[32,8], index: 2, kind: input, shape index: {}]   ;;  %s882_s3 = inlined_call_operand.vmem [shape: bf16[128,32], index: 3, kind: output, shape index: {0}]   ;;  %s883_s4 = inlined_call_operand.vmem [shape: f32[128,8], index: 4, kind: output, shape index: {1}]  }
   0x1   :  { %v33_v0 = vld [vmem:[%s879_s1] sm:$0xf]  ;;  %v656_v3 = vld [vmem:[%s880_s0 + $0x8] sm:$0xff]   ;;  %v657_v4 = vld [vmem:[%s880_s0 + $0x10] sm:$0xff]  }
   0x2   :  { %654 = vmatprep.subr.msk.bf16.mxu0 %vm99_vm0, %v33_v0  ;;  %v101_v1 = vsel %vm99_vm0, %v33_v0, 0  ;;  %v655_v2 = vld [vmem:[%s880_s0] sm:$0xff]   ;;  %v201_v6 = vld [vmem:[%s881_s2 + $0x8] sm:$0xff]  ;;  %v658_v7 = vld [vmem:[%s880_s0 + $0x18] sm:$0xff]  }
   0x3   :  { %597 = vmatpush3.bf16.msra.mxu0 %v101_v1  ;;  %598 = vmatprep.mubr.msk.bf16.mxu0 %vm74_vm1, %v655_v2  ;;  %v200_v5 = vld [vmem:[%s881_s2] sm:$0xff]  ;;  %v660_v10 = vld [vmem:[%s880_s0 + $0x28] sm:$0xff]   ;;  %v661_v11 = vld [vmem:[%s880_s0 + $0x30] sm:$0xff]  }
   0x4   :  { %v646_v8 = vpack.c.bf16 %v201_v6, %v200_v5  ;;  %v659_v9 = vld [vmem:[%s880_s0 + $0x20] sm:$0xff]   ;;  %v662_v12 = vld [vmem:[%s880_s0 + $0x38] sm:$0xff]   ;;  %v202_v13 = vld [vmem:[%s881_s2 + $0x10] sm:$0xff] }
   0x5   :  { %v203_v14 = vld [vmem:[%s881_s2 + $0x18] sm:$0xff] }
   0x6   :  { %599 = vmatmul.mubr.msk.bf16.vlgmr.msra.gmra.mrb[0].mxu0 %vm74_vm1, %v656_v3  ;;  %647 = vmatprep.subr.bf16.mxu1 %v646_v8  ;;  %v650_v15 = vpack.c.bf16 %v203_v14, %v202_v13 }
   0x7   :  { %602 = vmatprep.mubr.msk.bf16.mxu0 %vm74_vm1, %v657_v4  ;;  %649 = vmatpush3.bf16.msra.mxu1 %v646_v8 }
   0x8   :  { %651 = vmatprep.subr.bf16.mxu1 %v650_v15 }
   0xb   :  { %653 = vmatpush3.bf16.msra.mxu1 %v650_v15 }
   0xe   :  { %603 = vmatmul.mubr.msk.bf16.gmra.mrb[4].mxu0 %vm74_vm1, %v658_v7 }
   0xf   :  { %606 = vmatprep.mubr.msk.bf16.mxu0 %vm74_vm1, %v659_v9 }
  0x16   :  { %607 = vmatmul.mubr.msk.bf16.gmra.mrb[8].mxu0 %vm74_vm1, %v660_v10 }
  0x17   :  { %610 = vmatprep.mubr.msk.bf16.mxu0 %vm74_vm1, %v661_v11 }
  0x1e   :  { %611 = vmatmul.mubr.msk.bf16.gmra.mrb[12].mxu0 %vm74_vm1, %v662_v12 }
  0xd9   :  { %v600_v16 = vpop.f32.mrb[0].mxu0 }
  0xda   :  { %v553_v17 = vpack.c.bf16 %v600_v16, %v600_v16  ;;  %v137_v18 = vpop.f32.mrb[1].mxu0 }
  0xdb   :  { %v551_v19 = vpack.c.bf16 %v137_v18, %v137_v18  ;;  %v601_v20 = vpop.f32.mrb[2].mxu0  ;;  %622 = vmatprep.mubr.msk.f32.mxu1 %vm204_vm2, %v137_v18 }
  0xdc   :  { %481 = vst.msk [vmem:[%s882_s3 + $0x8] sm:$0xf] %vm478_vm3, %v553_v17  ;;  %v554_v21 = vpack.c.bf16 %v601_v20, %v601_v20  ;;  %v140_v22 = vpop.f32.mrb[3].mxu0 }
  0xdd   :  { %479 = vst.msk [vmem:[%s882_s3] sm:$0xf] %vm478_vm3, %v551_v19  ;;  %v552_v23 = vpack.c.bf16 %v140_v22, %v140_v22  ;;  %623 = vmatmul.mubr.msk.f32.vlgmr.msra.gmra.mrb[0].mxu1 %vm204_vm2, %v140_v22 }
  0xde   :  { %482 = vst.msk [vmem:[%s882_s3 + $0xc] sm:$0xf] %vm478_vm3, %v554_v21  ;;  %625 = vmatprep.mubr.msk.f32.mxu1 %vm204_vm2, %v600_v16 }
  0xdf   :  { %480 = vst.msk [vmem:[%s882_s3 + $0x4] sm:$0xf] %vm478_vm3, %v552_v23 }
  0xe1   :  { %v604_v24 = vpop.f32.mrb[4].mxu0  ;;  %626 = vmatmul.mubr.msk.f32.gmra.mrb[2].mxu1 %vm204_vm2, %v601_v20 }
  0xe2   :  { %v557_v25 = vpack.c.bf16 %v604_v24, %v604_v24  ;;  %v153_v26 = vpop.f32.mrb[5].mxu0 }
  0xe3   :  { %v555_v27 = vpack.c.bf16 %v153_v26, %v153_v26  ;;  %v605_v28 = vpop.f32.mrb[6].mxu0  ;;  %628 = vmatprep.mubr.msk.f32.mxu1 %vm204_vm2, %v153_v26 }
  0xe4   :  { %485 = vst.msk [vmem:[%s882_s3 + $0x18] sm:$0xf] %vm478_vm3, %v557_v25  ;;  %v558_v29 = vpack.c.bf16 %v605_v28, %v605_v28  ;;  %v156_v30 = vpop.f32.mrb[7].mxu0 }
  0xe5   :  { %483 = vst.msk [vmem:[%s882_s3 + $0x10] sm:$0xf] %vm478_vm3, %v555_v27  ;;  %v556_v31 = vpack.c.bf16 %v156_v30, %v156_v30  ;;  %629 = vmatmul.mubr.msk.f32.gmra.mrb[4].mxu1 %vm204_vm2, %v156_v30 }
  0xe6   :  { %486 = vst.msk [vmem:[%s882_s3 + $0x1c] sm:$0xf] %vm478_vm3, %v558_v29  ;;  %631 = vmatprep.mubr.msk.f32.mxu1 %vm204_vm2, %v604_v24 }
  0xe7   :  { %484 = vst.msk [vmem:[%s882_s3 + $0x14] sm:$0xf] %vm478_vm3, %v556_v31 }
  0xe9   :  { %v608_v32 = vpop.f32.mrb[8].mxu0  ;;  %632 = vmatmul.mubr.msk.f32.gmra.mrb[6].mxu1 %vm204_vm2, %v605_v28 }
  0xea   :  { %v561_v33 = vpack.c.bf16 %v608_v32, %v608_v32  ;;  %v169_v34 = vpop.f32.mrb[9].mxu0 }
  0xeb   :  { %v559_v35 = vpack.c.bf16 %v169_v34, %v169_v34  ;;  %v609_v36 = vpop.f32.mrb[10].mxu0  ;;  %634 = vmatprep.mubr.msk.f32.mxu1 %vm204_vm2, %v169_v34 }
  0xec   :  { %489 = vst.msk [vmem:[%s882_s3 + $0x28] sm:$0xf] %vm478_vm3, %v561_v33  ;;  %v562_v37 = vpack.c.bf16 %v609_v36, %v609_v36  ;;  %v172_v38 = vpop.f32.mrb[11].mxu0 }
  0xed   :  { %487 = vst.msk [vmem:[%s882_s3 + $0x20] sm:$0xf] %vm478_vm3, %v559_v35  ;;  %v560_v39 = vpack.c.bf16 %v172_v38, %v172_v38  ;;  %635 = vmatmul.mubr.msk.f32.gmra.mrb[8].mxu1 %vm204_vm2, %v172_v38 }
  0xee   :  { %490 = vst.msk [vmem:[%s882_s3 + $0x2c] sm:$0xf] %vm478_vm3, %v562_v37  ;;  %637 = vmatprep.mubr.msk.f32.mxu1 %vm204_vm2, %v608_v32 }
  0xef   :  { %488 = vst.msk [vmem:[%s882_s3 + $0x24] sm:$0xf] %vm478_vm3, %v560_v39 }
  0xf1   :  { %v612_v40 = vpop.f32.mrb[12].mxu0  ;;  %638 = vmatmul.mubr.msk.f32.gmra.mrb[10].mxu1 %vm204_vm2, %v609_v36 }
  0xf2   :  { %v565_v41 = vpack.c.bf16 %v612_v40, %v612_v40  ;;  %v185_v42 = vpop.f32.mrb[13].mxu0 }
  0xf3   :  { %v563_v43 = vpack.c.bf16 %v185_v42, %v185_v42  ;;  %v613_v44 = vpop.f32.mrb[14].mxu0  ;;  %640 = vmatprep.mubr.msk.f32.mxu1 %vm204_vm2, %v185_v42 }
  0xf4   :  { %493 = vst.msk [vmem:[%s882_s3 + $0x38] sm:$0xf] %vm478_vm3, %v565_v41  ;;  %v566_v45 = vpack.c.bf16 %v613_v44, %v613_v44  ;;  %v188_v46 = vpop.f32.mrb[15].mxu0 }
  0xf5   :  { %491 = vst.msk [vmem:[%s882_s3 + $0x30] sm:$0xf] %vm478_vm3, %v563_v43  ;;  %v564_v47 = vpack.c.bf16 %v188_v46, %v188_v46  ;;  %641 = vmatmul.mubr.msk.f32.gmra.mrb[12].mxu1 %vm204_vm2, %v188_v46 }
  0xf6   :  { %494 = vst.msk [vmem:[%s882_s3 + $0x3c] sm:$0xf] %vm478_vm3, %v566_v45  ;;  %643 = vmatprep.mubr.msk.f32.mxu1 %vm204_vm2, %v612_v40 }
  0xf7   :  { %492 = vst.msk [vmem:[%s882_s3 + $0x34] sm:$0xf] %vm478_vm3, %v564_v47 }
  0xf9   :  { %644 = vmatmul.mubr.msk.f32.gmra.mrb[14].mxu1 %vm204_vm2, %v613_v44 }
 0x1b0   :  { %v624_v48 = vpop.f32.mrb[0].mxu1 }
 0x1b1   :  { %399 = vst.msk [vmem:[%s883_s4 + $0x8] sm:$0xff] %vm74_vm1, %v624_v48  ;;  %v319_v49 = vpop.f32.mrb[1].mxu1 }
 0x1b2   :  { %398 = vst.msk [vmem:[%s883_s4] sm:$0xff] %vm74_vm1, %v319_v49 }
 0x1b4   :  { %v627_v50 = vpop.f32.mrb[2].mxu1 }
 0x1b5   :  { %401 = vst.msk [vmem:[%s883_s4 + $0x18] sm:$0xff] %vm74_vm1, %v627_v50  ;;  %v329_v51 = vpop.f32.mrb[3].mxu1 }
 0x1b6   :  { %400 = vst.msk [vmem:[%s883_s4 + $0x10] sm:$0xff] %vm74_vm1, %v329_v51 }
 0x1b8   :  { %v630_v52 = vpop.f32.mrb[4].mxu1 }
 0x1b9   :  { %403 = vst.msk [vmem:[%s883_s4 + $0x28] sm:$0xff] %vm74_vm1, %v630_v52  ;;  %v339_v53 = vpop.f32.mrb[5].mxu1 }
 0x1ba   :  { %402 = vst.msk [vmem:[%s883_s4 + $0x20] sm:$0xff] %vm74_vm1, %v339_v53 }
 0x1bc   :  { %v633_v54 = vpop.f32.mrb[6].mxu1 }
 0x1bd   :  { %405 = vst.msk [vmem:[%s883_s4 + $0x38] sm:$0xff] %vm74_vm1, %v633_v54  ;;  %v349_v55 = vpop.f32.mrb[7].mxu1 }
 0x1be   :  { %404 = vst.msk [vmem:[%s883_s4 + $0x30] sm:$0xff] %vm74_vm1, %v349_v55 }
 0x1c0   :  { %v636_v56 = vpop.f32.mrb[8].mxu1 }
 0x1c1   :  { %407 = vst.msk [vmem:[%s883_s4 + $0x48] sm:$0xff] %vm74_vm1, %v636_v56  ;;  %v359_v57 = vpop.f32.mrb[9].mxu1 }
 0x1c2   :  { %406 = vst.msk [vmem:[%s883_s4 + $0x40] sm:$0xff] %vm74_vm1, %v359_v57 }
 0x1c4   :  { %v639_v58 = vpop.f32.mrb[10].mxu1 }
 0x1c5   :  { %409 = vst.msk [vmem:[%s883_s4 + $0x58] sm:$0xff] %vm74_vm1, %v639_v58  ;;  %v369_v59 = vpop.f32.mrb[11].mxu1 }
 0x1c6   :  { %408 = vst.msk [vmem:[%s883_s4 + $0x50] sm:$0xff] %vm74_vm1, %v369_v59 }
 0x1c8   :  { %v642_v60 = vpop.f32.mrb[12].mxu1 }
 0x1c9   :  { %411 = vst.msk [vmem:[%s883_s4 + $0x68] sm:$0xff] %vm74_vm1, %v642_v60  ;;  %v379_v61 = vpop.f32.mrb[13].mxu1 }
 0x1ca   :  { %410 = vst.msk [vmem:[%s883_s4 + $0x60] sm:$0xff] %vm74_vm1, %v379_v61 }
 0x1cc   :  { %v645_v62 = vpop.f32.mrb[14].mxu1 }
 0x1cd   :  { %413 = vst.msk [vmem:[%s883_s4 + $0x78] sm:$0xff] %vm74_vm1, %v645_v62  ;;  %v389_v63 = vpop.f32.mrb[15].mxu1 }
 0x1ce   :  { %412 = vst.msk [vmem:[%s883_s4 + $0x70] sm:$0xff] %vm74_vm1, %v389_v63 }

</bundles_post_ra>
